<compile_context>
chip_gen: v5e
topology: v5e:2x2
jax: 0.10.0
libtpu: 0.0.40
codegen_flags: <defaults>
</compile_context>

<pallas_src>
import jax
import jax.numpy as jnp
from jax import lax
from jax.experimental import pallas as pl
from jax.experimental.pallas import tpu as pltpu


def _round_up(n: int, m: int) -> int:
    return (n + m - 1) // m * m


def _row_tile(n_pad: int) -> int:
    """Row tile for the pure-matmul QKV projection (row-parallel)."""
    for t in (512, 256, 128):
        if n_pad % t == 0:
            return t
    return n_pad  # unreachable: n_pad is a multiple of 128


# ---------------------------------------------------------------------------
# Kernel 1: fused QKV projection (one row tile of one batch element)
# ---------------------------------------------------------------------------
def make_qkv_proj_kernel(dim: int, scale: float):
    def qkv_proj_kernel(x_ref, wqkv_ref, qkv_ref):
        # Operands stay in their input dtype (bf16 in production); f32 accumulate.
        acc = jnp.dot(x_ref[0], wqkv_ref[...],
                      preferred_element_type=jnp.float32)          # (t, 3D)
        # Fold the softmax scale into the q columns once here (much cheaper
        # than scaling per (query-tile, head) later) and keep a single
        # lane-dense store of the whole (t, 3D) slab.
        col = lax.broadcasted_iota(jnp.int32, acc.shape, 1)
        acc = acc * jnp.where(col < dim, scale, 1.0)
        qkv_ref[0] = acc.astype(qkv_ref.dtype)

    return qkv_proj_kernel


# ---------------------------------------------------------------------------
# Kernel 2: attention + output projection (one query tile of one batch element)
# ---------------------------------------------------------------------------
def make_attn_kernel(n_heads: int, head_dim: int, n_valid: int, n_pad: int,
                     tq: int, *, use_bf16_exp: bool, approx_recip: bool):
    dim = n_heads * head_dim
    needs_mask = n_valid != n_pad

    def attn_kernel(qkv_ref, wout_ref, bout_ref, o_ref, y_acc):
        # qkv_ref : (1, n_pad, 3D) resident block for this batch element
        # wout_ref: (D, D)   bout_ref: (1, D)
        # o_ref   : (1, tq, D)   y_acc: (tq, D) f32 scratch
        row0 = pl.multiple_of(pl.program_id(1) * tq, tq)

        if needs_mask:
            # Hoisted out of the head loop (broadcast_in_dim is not CSE'd).
            key_idx = lax.broadcasted_iota(jnp.int32, (tq, n_pad), 1)
            key_valid = key_idx < n_valid

        # TODO(synk): for configs with many heads (>=12) switch this static
        # loop to lax.fori_loop(..., unroll=2..4) with pl.ds head offsets to
        # bound live ranges and Mosaic compile time.
        for h in range(n_heads):
            c0 = h * head_dim
            # Ref slices: load only the (tq, hd)/(n_pad, hd) columns needed
            # per head; never materialize the whole (n_pad, 3D) block.
            q_h = qkv_ref[0, pl.ds(row0, tq), c0:c0 + head_dim]         # (tq, hd), pre-scaled
            k_h = qkv_ref[0, :, dim + c0:dim + c0 + head_dim]           # (n_pad, hd)
            v_h = qkv_ref[0, :, 2 * dim + c0:2 * dim + c0 + head_dim]   # (n_pad, hd)

            # Scores: same NT dimension numbers as the reference flash kernel,
            # so no explicit K transpose is materialized.
            s = lax.dot_general(q_h, k_h, (((1,), (1,)), ((), ())),
                                preferred_element_type=jnp.float32)     # (tq, n_pad)
            if needs_mask:
                s = jnp.where(key_valid, s, -jnp.inf)

            # Numerically stable softmax; normalization deferred past PV.
            m = jnp.max(s, axis=-1, keepdims=True)
            if use_bf16_exp:
                # bf16 exp ~2x EUP throughput on v6e/v7x; row-sum kept in f32.
                e = jnp.exp((s - m).astype(jnp.bfloat16))
                row_sum = jnp.sum(e, axis=-1, keepdims=True,
                                  dtype=jnp.float32)
            else:
                e = jnp.exp(s - m)
                row_sum = jnp.sum(e, axis=-1, keepdims=True)

            # Unnormalized PV matmul; normalize the small (tq, hd) result
            # afterwards (N/hd fewer VPU multiplies than scaling the probs).
            pv = jnp.dot(e.astype(v_h.dtype), v_h,
                         preferred_element_type=jnp.float32)            # (tq, hd)
            o_h = pv * pl.reciprocal(row_sum, approx=approx_recip)

            # Per-head output projection accumulated into a lane-dense f32
            # scratch slab: no sub-128-lane masked stores, no bf16 round trip
            # of the attention output.
            contrib = jnp.dot(o_h.astype(wout_ref.dtype),
                              wout_ref[c0:c0 + head_dim, :],
                              preferred_element_type=jnp.float32)       # (tq, D)
            if h == 0:
                y_acc[...] = contrib
            else:
                y_acc[...] += contrib

        o_ref[0] = (y_acc[...] + bout_ref[...]).astype(o_ref.dtype)

    return attn_kernel


# ---------------------------------------------------------------------------
# Wrapper
# ---------------------------------------------------------------------------
def multi_head_attention(x, w_qkv_t, w_out_t, b_out, *, n_heads: int):
    """x: (B, N, D); w_qkv_t: (D, 3D); w_out_t: (D, D); b_out: (D,)."""
    B, N, D = x.shape
    assert D % n_heads == 0, "Dimensions must be divisible by n_heads"
    head_dim = D // n_heads
    scale = head_dim ** (-0.5)
    dtype = x.dtype
    itemsize = jnp.dtype(dtype).itemsize

    # Pad sequence to a multiple of 128 (lane-friendly tiles, keeps the qi grid
    # axis); padded keys get -inf scores in-kernel, padded rows sliced off.
    tq = 128
    n_pad = _round_up(N, tq)
    n_qt = n_pad // tq
    x_p = x if n_pad == N else jnp.pad(x, ((0, 0), (0, n_pad - N), (0, 0)))

    t1 = _row_tile(n_pad)
    b_out2 = b_out.reshape(1, D)

    # Explicit VMEM budget (kernel 2 dominates): resident qkv + weights double
    # buffered, output tile, f32 accumulator scratch, plus headroom.
    need = (2 * (n_pad * 3 * D + D * D + tq * D + D) * itemsize
            + tq * D * 4 + (2 << 20))
    vmem_limit = int(min(max(need, 32 << 20), 64 << 20))
    cparams = pltpu.CompilerParams(
        dimension_semantics=("parallel", "parallel"),
        vmem_limit_bytes=vmem_limit)

    # --- 1) qkv = x @ Wqkv (q columns pre-scaled) -> (B, n_pad, 3D) ---------
    qkv_cost = pl.CostEstimate(
        flops=2 * B * n_pad * D * 3 * D,
        transcendentals=0,
        bytes_accessed=int((B * n_pad * 4 * D + 3 * D * D) * itemsize))
    qkv = pl.pallas_call(
        make_qkv_proj_kernel(D, scale),
        out_shape=jax.ShapeDtypeStruct((B, n_pad, 3 * D), dtype),
        grid_spec=pltpu.PrefetchScalarGridSpec(
            num_scalar_prefetch=0,
            grid=(B, n_pad // t1),
            in_specs=[
                pl.BlockSpec((1, t1, D), lambda b, i: (b, i, 0)),     # x tile
                pl.BlockSpec((D, 3 * D), lambda b, i: (0, 0)),        # Wqkv
            ],
            out_specs=pl.BlockSpec((1, t1, 3 * D), lambda b, i: (b, i, 0)),
        ),
        compiler_params=cparams,
        cost_estimate=qkv_cost,
    )(x_p, w_qkv_t)

    # --- 2) attention + output projection -----------------------------------
    attn_cost = pl.CostEstimate(
        flops=4 * B * n_pad * n_pad * D + 2 * B * n_pad * D * D,
        transcendentals=B * n_heads * n_pad * n_pad,
        bytes_accessed=int((B * n_pad * 4 * D + D * D + D) * itemsize))
    kernel = make_attn_kernel(
        n_heads, head_dim, N, n_pad, tq,
        use_bf16_exp=(dtype == jnp.bfloat16),
        approx_recip=(dtype == jnp.bfloat16))

    out = pl.pallas_call(
        kernel,
        out_shape=jax.ShapeDtypeStruct((B, n_pad, D), dtype),
        grid_spec=pltpu.PrefetchScalarGridSpec(
            num_scalar_prefetch=0,
            grid=(B, n_qt),
            in_specs=[
                # Resident qkv block of this batch element (constant across
                # qi so it is fetched once per batch element); the current
                # query tile's rows are ref-sliced from it in-kernel — no
                # duplicate per-tile q stream.
                pl.BlockSpec((1, n_pad, 3 * D), lambda b, qi: (b, 0, 0)),
                pl.BlockSpec((D, D), lambda b, qi: (0, 0)),           # Wout
                pl.BlockSpec((1, D), lambda b, qi: (0, 0)),           # bout
            ],
            out_specs=pl.BlockSpec((1, tq, D), lambda b, qi: (b, qi, 0)),
            scratch_shapes=[pltpu.VMEM((tq, D), jnp.float32)],
        ),
        compiler_params=cparams,
        cost_estimate=attn_cost,
    )(qkv, w_out_t, b_out2)

    return out if n_pad == N else out[:, :N, :]


# ---------------------------------------------------------------------------
# Pure-JAX reference
# ---------------------------------------------------------------------------
def reference_mha(x, w_qkv_t, w_out_t, b_out, *, n_heads: int):
    B, N, D = x.shape
    hd = D // n_heads
    qkv = jnp.einsum('bnd,de->bne', x, w_qkv_t)
    q, k, v = jnp.split(qkv, 3, axis=-1)

    def split_heads(t):
        return t.reshape(B, N, n_heads, hd).transpose(0, 2, 1, 3)   # b h n d

    q, k, v = map(split_heads, (q, k, v))
    dots = jnp.einsum('bhnd,bhmd->bhnm', q, k) * (hd ** -0.5)
    attn = jax.nn.softmax(dots, axis=-1)
    out = jnp.einsum('bhnm,bhmd->bhnd', attn, v)
    out = out.transpose(0, 2, 1, 3).reshape(B, N, D)
    return jnp.einsum('bnd,de->bne', out, w_out_t) + b_out


if __name__ == "__main__":
    # Small shapes consistent with the module: batch=2, seq=8, dim=32, heads=4.
    B, N, D, H = 2, 8, 32, 4

    key = jax.random.PRNGKey(0)
    kx, k1, k2, k3 = jax.random.split(key, 4)

    x = jax.random.normal(kx, (B, N, D), dtype=jnp.float32)

    # PyTorch Linear weights are (out, in); we store the (in, out) transposes.
    w_qkv_t = jax.random.normal(k1, (D, 3 * D), dtype=jnp.float32) * 0.05
    w_out_t = jax.random.normal(k2, (D, D), dtype=jnp.float32) * 0.05
    b_out = jax.random.normal(k3, (D,), dtype=jnp.float32) * 0.05

    y = multi_head_attention(x, w_qkv_t, w_out_t, b_out, n_heads=H)
    y = jax.block_until_ready(y)

    y_ref = reference_mha(x, w_qkv_t, w_out_t, b_out, n_heads=H)
    assert y.shape == y_ref.shape, "shape mismatch vs reference"
    assert jnp.allclose(y, y_ref, atol=1e-3, rtol=1e-3), "mismatch vs reference"

    print("KERNEL_OK")
</pallas_src>

<mosaic_0001>
module attributes {stable_mosaic.version = 11 : i64} {
  func.func @qkv_proj_kernel(%arg0: i32, %arg1: i32, %arg2: memref<1x128x32xf32, #tpu.memory_space<vmem>>, %arg3: memref<32x96xf32, #tpu.memory_space<vmem>>, %arg4: memref<1x128x96xf32, #tpu.memory_space<vmem>>) attributes {dimension_semantics = [#tpu.dimension_semantics<parallel>, #tpu.dimension_semantics<parallel>], iteration_bounds = array<i64: 2, 1>, scalar_prefetch = 0 : i64, scratch_operands = 0 : i64, tpu.core_type = #tpu.core_type<tc>, window_params = [{transform_indices = @transform_0, window_bounds = array<i64: 1, 128, 32>}, {pipeline_mode = #tpu.pipeline_mode<synchronous>, transform_indices = @transform_1, window_bounds = array<i64: 32, 96>}, {transform_indices = @transform_2, window_bounds = array<i64: 1, 128, 96>}]} {
    %c0 = arith.constant 0 : index
    %c0_0 = arith.constant 0 : index
    %c0_1 = arith.constant 0 : index
    %0 = vector.load %arg2[%c0, %c0_0, %c0_1] : memref<1x128x32xf32, #tpu.memory_space<vmem>>, vector<1x128x32xf32>
    %1 = vector.shape_cast %0 : vector<1x128x32xf32> to vector<128x32xf32>
    %c0_2 = arith.constant 0 : index
    %c0_3 = arith.constant 0 : index
    %2 = vector.load %arg3[%c0_2, %c0_3] : memref<32x96xf32, #tpu.memory_space<vmem>>, vector<32x96xf32>
    %cst = arith.constant dense<0.000000e+00> : vector<128x96xf32>
    %3 = tpu.matmul %1, %2, %cst {dimension_numbers = #tpu.dot_dimension_numbers<[1], [0], [0], [1], [0, 0, 1, 1], [], []>} : vector<128x32xf32>, vector<32x96xf32>, vector<128x96xf32> -> vector<128x96xf32>
    %4 = tpu.iota {dimensions = array<i32: 1>} : vector<128x96xi32>
    %c32_i32 = arith.constant 32 : i32
    %5 = vector.broadcast %c32_i32 : i32 to vector<128x96xi32>
    %6 = arith.cmpi slt, %4, %5 : vector<128x96xi32>
    %cst_4 = arith.constant 0.353553385 : f32
    %cst_5 = arith.constant 1.000000e+00 : f32
    %7 = vector.broadcast %cst_4 : f32 to vector<128x96xf32>
    %8 = vector.broadcast %cst_5 : f32 to vector<128x96xf32>
    %9 = arith.select %6, %7, %8 : vector<128x96xi1>, vector<128x96xf32>
    %10 = arith.mulf %3, %9 : vector<128x96xf32>
    %c0_6 = arith.constant 0 : index
    %c0_7 = arith.constant 0 : index
    %c0_8 = arith.constant 0 : index
    %11 = vector.load %arg4[%c0_6, %c0_7, %c0_8] : memref<1x128x96xf32, #tpu.memory_space<vmem>>, vector<1x128x96xf32>
    %12 = vector.shape_cast %11 : vector<1x128x96xf32> to vector<128x96xf32>
    %13 = vector.shape_cast %10 : vector<128x96xf32> to vector<1x128x96xf32>
    tpu.vector_store %arg4[%c0_6, %c0_7, %c0_8], %13 {strides = array<i32>} : memref<1x128x96xf32, #tpu.memory_space<vmem>>, vector<1x128x96xf32>,
    return
  }
  func.func @transform_0(%arg0: i32, %arg1: i32) -> (i32, i32, i32) {
    %c0_i32 = arith.constant 0 : i32
    %c0_i32_0 = arith.constant 0 : i32
    return %arg0, %arg1, %c0_i32 : i32, i32, i32
  }
  func.func @transform_1(%arg0: i32, %arg1: i32) -> (i32, i32) {
    %c0_i32 = arith.constant 0 : i32
    %c0_i32_0 = arith.constant 0 : i32
    %c0_i32_1 = arith.constant 0 : i32
    return %c0_i32, %c0_i32_0 : i32, i32
  }
  func.func @transform_2(%arg0: i32, %arg1: i32) -> (i32, i32, i32) {
    %c0_i32 = arith.constant 0 : i32
    %c0_i32_0 = arith.constant 0 : i32
    return %arg0, %arg1, %c0_i32 : i32, i32, i32
  }
}

</mosaic_0001>

<bundles_post_ra>
// kernel: tpu_custom_call.1
= control target key start
LH: loop header
LB: loop body
LE: loop exit
PB: predicated region body
PF: predicated region fallthrough
CT: control target
= control target key end

     0   :  { %s547_s9 = smov 0   ;;  %s549_s10 = smov 0   ;;  %s667_s0 = inlined_call_operand.vmem [shape: f32[2,128,32], index: 0, kind: input, shape index: {}]   ;;  %s668_s1 = inlined_call_operand.vmem [shape: f32[32,96], index: 1, kind: input, shape index: {}]   ;;  %s669_s2 = inlined_call_operand.vmem [shape: f32[2,128,96], index: 2, kind: output, shape index: {}]  }
   0x1   :  { %s551_s11 = smov 0  }
   0x2 LB: > { %s24_s12 = sadd.s32 1, %s525_s10  ;;  %p445_p0 = scmp.ge.s32.totalorder %s529_s11, 1  ;;  %s529_s11 = sphi %s551_s11, %s12_s11   ;;  %s525_s10 = sphi %s549_s10, %s671_s10   ;;  %s521_s9 = sphi %s547_s9, %s670_s9  }
   0x3   : > { %p26_p1 = scmp.ge.s32.totalorder %s24_s12, 2  ;;  %p133_p2 = scmp.lt.s32.totalorder %s529_s11, 3 }
   0x5   : > { %s673_s12 = smov (%p26_p1, %s24_s12), 0  ;;  %p134_p3 = pnand %p445_p0, %p133_p2 }
   0x6   : > { %p164_p4 = scmp.lt.s32.totalorder (!%p134_p3), %s521_s9, 1 }
   0x7   : > { %137 = sbr.rel (%p134_p3) target bundleno = 180 (0xb4), region = 28 }
   0xc   : > { %v202_v0 = vld [vmem:[%s668_s1 + $0x18] sm:$0xff]  ;;  %v201_v1 = vld [vmem:[%s668_s1 + $0x10] sm:$0xff]  ;;  %v200_v2 = vld [vmem:[%s668_s1 + $0x8] sm:$0xff]  ;;  %s675_s9 = smov (!%p164_p4, %s521_s9), 1  ;;  %vm203_vm0 = vcmask 261120   ;;  %v317_v20 = vlaneseq  ;;  %v531_v22 = vmov 1.0  }
   0xd   : > { %471 = vmatpush.msra.mxu2 %v202_v0  ;;  %472 = vmatpush.msra.mxu3 %v202_v0  ;;  %v199_v3 = vld [vmem:[%s668_s1] sm:$0xff]  ;;  %s468_s21 = sshll.u32 %s675_s9, 7  ;;  %vm337_vm2 = vcmask 785408  }
   0xe   : > { %264 = vmatpush.msra.mxu0 %v202_v0  ;;  %470 = vmatpush.msra.mxu1 %v202_v0  ;;  %s585_s24 = scalar_lea.vmem %s667_s0, %s468_s21  ;;  %v318_v21 = vand.u32 127, %v317_v20  ;;  %s624_s27 = scalar_lea.vmem %s669_s2, %s468_s21 }
   0xf   : > { %474 = vmatpush.msra.mxu2 %v201_v1  ;;  %475 = vmatpush.msra.mxu3 %v201_v1  ;;  %v191_v4 = vld [vmem:[%s585_s24 + $0x40] sm:$0xff]  ;;  %v192_v8 = vld [vmem:[%s585_s24 + $0x48] sm:$0xff]  ;;  %v193_v12 = vld [vmem:[%s585_s24 + $0x50] sm:$0xff] }
  0x10   : > { %265 = vmatpush.msra.mxu0 %v201_v1  ;;  %473 = vmatpush.msra.mxu1 %v201_v1  ;;  %v195_v5 = vld [vmem:[%s585_s24 + $0x60] sm:$0xff]  ;;  %v196_v9 = vld [vmem:[%s585_s24 + $0x68] sm:$0xff]  ;;  %v197_v13 = vld [vmem:[%s585_s24 + $0x70] sm:$0xff]  ;;  %vm319_vm1 = vcmp.lt.s32.totalorder %v318_v21, 32 }
  0x11   : > { %477 = vmatpush.msra.mxu2 %v200_v2  ;;  %478 = vmatpush.msra.mxu3 %v200_v2  ;;  %v183_v6 = vld [vmem:[%s585_s24] sm:$0xff]  ;;  %v184_v10 = vld [vmem:[%s585_s24 + $0x8] sm:$0xff]  ;;  %v185_v14 = vld [vmem:[%s585_s24 + $0x10] sm:$0xff]  ;;  %v320_v23 = vsel %vm319_vm1, 0.35355338, %v531_v22 }
  0x12   : > { %266 = vmatpush.msra.mxu0 %v200_v2  ;;  %476 = vmatpush.msra.mxu1 %v200_v2  ;;  %v187_v7 = vld [vmem:[%s585_s24 + $0x20] sm:$0xff]  ;;  %v188_v11 = vld [vmem:[%s585_s24 + $0x28] sm:$0xff]  ;;  %v189_v15 = vld [vmem:[%s585_s24 + $0x30] sm:$0xff] }
  0x13   : > { %480 = vmatpush.msra.mxu2 %v199_v3  ;;  %481 = vmatpush.msra.mxu3 %v199_v3  ;;  %v194_v16 = vld [vmem:[%s585_s24 + $0x58] sm:$0xff] }
  0x14   : > { %458 = vmatmul.msk.f32.vlgmr.msra.gmra.mxu2 %vm203_vm0, %v191_v4  ;;  %462 = vmatmul.msk.f32.vlgmr.msra.gmra.mxu3 %vm203_vm0, %v195_v5  ;;  %v198_v17 = vld [vmem:[%s585_s24 + $0x78] sm:$0xff] }
  0x15   : > { %267 = vmatpush.msra.mxu0 %v199_v3  ;;  %479 = vmatpush.msra.mxu1 %v199_v3  ;;  %v186_v18 = vld [vmem:[%s585_s24 + $0x18] sm:$0xff] }
  0x16   : > { %450 = vmatmul.msk.f32.vlgmr.msra.gmra.mxu0 %vm203_vm0, %v183_v6  ;;  %454 = vmatmul.msk.f32.vlgmr.msra.gmra.mxu1 %vm203_vm0, %v187_v7  ;;  %v190_v19 = vld [vmem:[%s585_s24 + $0x38] sm:$0xff] }
  0x1c   : > { %459 = vmatmul.msk.f32.gmra.mxu2 %vm203_vm0, %v192_v8  ;;  %463 = vmatmul.msk.f32.gmra.mxu3 %vm203_vm0, %v196_v9 }
  0x1e   : > { %451 = vmatmul.msk.f32.gmra.mxu0 %vm203_vm0, %v184_v10  ;;  %455 = vmatmul.msk.f32.gmra.mxu1 %vm203_vm0, %v188_v11 }
  0x24   : > { %460 = vmatmul.msk.f32.gmra.mxu2 %vm203_vm0, %v193_v12  ;;  %464 = vmatmul.msk.f32.gmra.mxu3 %vm203_vm0, %v197_v13 }
  0x26   : > { %452 = vmatmul.msk.f32.gmra.mxu0 %vm203_vm0, %v185_v14  ;;  %456 = vmatmul.msk.f32.gmra.mxu1 %vm203_vm0, %v189_v15 }
  0x2c   : > { %461 = vmatmul.msk.f32.gmra.mxu2 %vm203_vm0, %v194_v16  ;;  %465 = vmatmul.msk.f32.gmra.mxu3 %vm203_vm0, %v198_v17 }
  0x2e   : > { %453 = vmatmul.msk.f32.gmra.mxu0 %vm203_vm0, %v186_v18  ;;  %457 = vmatmul.msk.f32.gmra.mxu1 %vm203_vm0, %v190_v19 }
  0x93   : > { %v269_v24 = vpop.f32.mrf.mxu0  ;;  %v281_v25 = vpop.f32.mrf.mxu1 }
  0x94   : > { %v321_v26 = vmul.f32 %v320_v23, %v269_v24  ;;  %v325_v27 = vmul.f32 %v320_v23, %v281_v25 }
  0x96   : > { %338 = vst.msk [vmem:[%s624_s27] sm:$0xff] %vm337_vm2, %v321_v26 }
  0x97   : > { %342 = vst.msk [vmem:[%s624_s27 + $0x20] sm:$0xff] %vm337_vm2, %v325_v27  ;;  %v293_v28 = vpop.f32.mrf.mxu2  ;;  %v305_v29 = vpop.f32.mrf.mxu3 }
  0x98   : > { %v329_v30 = vmul.f32 %v320_v23, %v293_v28  ;;  %v333_v31 = vmul.f32 %v320_v23, %v305_v29 }
  0x9a   : > { %346 = vst.msk [vmem:[%s624_s27 + $0x40] sm:$0xff] %vm337_vm2, %v329_v30 }
  0x9b   : > { %350 = vst.msk [vmem:[%s624_s27 + $0x60] sm:$0xff] %vm337_vm2, %v333_v31  ;;  %v272_v32 = vpop.f32.mrf.mxu0  ;;  %v284_v33 = vpop.f32.mrf.mxu1 }
  0x9c   : > { %v322_v34 = vmul.f32 %v320_v23, %v272_v32  ;;  %v326_v35 = vmul.f32 %v320_v23, %v284_v33 }
  0x9e   : > { %339 = vst.msk [vmem:[%s624_s27 + $0x8] sm:$0xff] %vm337_vm2, %v322_v34 }
  0x9f   : > { %343 = vst.msk [vmem:[%s624_s27 + $0x28] sm:$0xff] %vm337_vm2, %v326_v35  ;;  %v296_v36 = vpop.f32.mrf.mxu2  ;;  %v308_v37 = vpop.f32.mrf.mxu3 }
  0xa0   : > { %v330_v38 = vmul.f32 %v320_v23, %v296_v36  ;;  %v334_v39 = vmul.f32 %v320_v23, %v308_v37 }
  0xa2   : > { %347 = vst.msk [vmem:[%s624_s27 + $0x48] sm:$0xff] %vm337_vm2, %v330_v38 }
  0xa3   : > { %351 = vst.msk [vmem:[%s624_s27 + $0x68] sm:$0xff] %vm337_vm2, %v334_v39  ;;  %v275_v40 = vpop.f32.mrf.mxu0  ;;  %v287_v41 = vpop.f32.mrf.mxu1 }
  0xa4   : > { %v323_v42 = vmul.f32 %v320_v23, %v275_v40  ;;  %v327_v43 = vmul.f32 %v320_v23, %v287_v41 }
  0xa6   : > { %340 = vst.msk [vmem:[%s624_s27 + $0x10] sm:$0xff] %vm337_vm2, %v323_v42 }
  0xa7   : > { %344 = vst.msk [vmem:[%s624_s27 + $0x30] sm:$0xff] %vm337_vm2, %v327_v43  ;;  %v299_v44 = vpop.f32.mrf.mxu2  ;;  %v311_v45 = vpop.f32.mrf.mxu3 }
  0xa8   : > { %v331_v46 = vmul.f32 %v320_v23, %v299_v44  ;;  %v335_v47 = vmul.f32 %v320_v23, %v311_v45 }
  0xaa   : > { %348 = vst.msk [vmem:[%s624_s27 + $0x50] sm:$0xff] %vm337_vm2, %v331_v46 }
  0xab   : > { %352 = vst.msk [vmem:[%s624_s27 + $0x70] sm:$0xff] %vm337_vm2, %v335_v47  ;;  %v278_v48 = vpop.f32.mrf.mxu0  ;;  %v290_v49 = vpop.f32.mrf.mxu1 }
  0xac   : > { %v324_v50 = vmul.f32 %v320_v23, %v278_v48  ;;  %v328_v51 = vmul.f32 %v320_v23, %v290_v49 }
  0xae   : > { %341 = vst.msk [vmem:[%s624_s27 + $0x18] sm:$0xff] %vm337_vm2, %v324_v50 }
  0xaf   : > { %345 = vst.msk [vmem:[%s624_s27 + $0x38] sm:$0xff] %vm337_vm2, %v328_v51  ;;  %v302_v52 = vpop.f32.mrf.mxu2  ;;  %v314_v53 = vpop.f32.mrf.mxu3 }
  0xb0   : > { %v332_v54 = vmul.f32 %v320_v23, %v302_v52  ;;  %v336_v55 = vmul.f32 %v320_v23, %v314_v53 }
  0xb2   : > { %349 = vst.msk [vmem:[%s624_s27 + $0x58] sm:$0xff] %vm337_vm2, %v332_v54 }
  0xb3   : > { %353 = vst.msk [vmem:[%s624_s27 + $0x78] sm:$0xff] %vm337_vm2, %v336_v55 }
  0xb4 PF: > { %s12_s11 = sadd.s32 1, %s529_s11   ;;  %s670_s9 = smov %s525_s10 }
  0xb5   : > { %p9_p5 = scmp.ge.s32.totalorder %s12_s11, 4   ;;  %s671_s10 = smov %s673_s12 }
  0xb7   :  { %11 = sbr.rel (!%p9_p5) target bundleno = 2 (0x2), region = 58 }

</bundles_post_ra>
